<compile_context>
chip_gen: v7x
topology: tpu7x:2x2x1
jax: 0.10.0
libtpu: 0.0.40
codegen_flags: <defaults>
</compile_context>

<pallas_src>
import functools

import jax
import jax.numpy as jnp
import numpy as np
from jax.experimental import pallas as pl
from jax.experimental.pallas import tpu as pltpu


def randtest_kernel(p_ref, mult_ref, v_ref, cnt_ref, *, n_rows, n_valid,
                    targets, eps):
    """p_ref:    SMEM (n_rows,) f32  -- p_rows[r] = rows[r] . hermite
       mult_ref: SMEM (3, 5)    f32  -- the three multiplier vectors
       v_ref:    VMEM (3, 8, W) f32  -- v_ref[k, s, l] = v_{k+1} of candidate s*W+l
       cnt_ref:  VMEM (1, W)    i32  -- per-lane acceptance-test hit counts
    """
    _, nsub, w = v_ref.shape
    log2n = n_rows.bit_length() - 1            # n_rows is a power of two (checked)

    # Candidate id laid out densely over (sublane, lane) -> one full vreg tile.
    sub = jax.lax.broadcasted_iota(jnp.int32, (nsub, w), 0)
    lane = jax.lax.broadcasted_iota(jnp.int32, (nsub, w), 1)
    cid = sub * w + lane

    # Hoist all SMEM scalar reads out of the row-position loop.
    p = [p_ref[r] for r in range(n_rows)]                          # n_rows scalars
    mv = [[mult_ref[k, i] for i in range(5)] for k in range(3)]    # 15 scalars

    acc = [None, None, None]
    for i in range(5):                          # matrix row position (row1..row5)
        d = (cid >> (log2n * i)) & (n_rows - 1)  # digit_i(n): shift/and only
        # basis_i[n] = p[d] via a balanced select tree over the digit bits.
        level = p
        for bit in range(log2n):
            take_hi = ((d >> bit) & 1) == 1
            level = [jnp.where(take_hi, level[j + 1], level[j])
                     for j in range(0, len(level), 2)]
        basis_i = level[0]                       # (nsub, w) f32
        for k in range(3):                       # scalar-splat FMA, pure VPU
            term = mv[k][i] * basis_i
            acc[k] = term if i == 0 else acc[k] + term

    for k in range(3):                           # full-vreg unmasked stores
        v_ref[k] = acc[k]

    # Fused acceptance test (|v_k - target_k| <= eps); padding lanes masked out
    # so they can never produce false matches.
    match = cid < n_valid
    for k in range(3):
        match = jnp.logical_and(match, jnp.abs(acc[k] - targets[k]) <= eps)
    cnt_f = jnp.sum(jnp.where(match, 1.0, 0.0), axis=0, keepdims=True)  # (1, w)
    cnt_ref[...] = cnt_f.astype(jnp.int32)


def randtest_forward(p_rows, mult, n_candidates, *,
                     targets=(7.81, 11.32, 15.82), eps=0.005):
    """Evaluate all n_rows**5 candidate matrices.

    p_rows: (n_rows,) f32, rows @ hermite
    mult:   (3, 5)    f32
    Returns:
      v:   (n_candidates, 3) f32  -- [v1, v2, v3] per candidate
      cnt: (1, W) int32           -- per-lane acceptance-test hit counts
    """
    n_rows = int(p_rows.shape[0])
    if n_rows & (n_rows - 1):
        # TODO(synk): the real [-9, 9) search has n_rows=18 (non power of two);
        # that needs a host-precomputed digit table DMA'd in -- vector integer
        # div/mod has no VPU fast path, so we refuse to fall back to it here.
        raise NotImplementedError("randtest_kernel requires power-of-two n_rows")

    nsub = 8                                     # sublanes per vreg
    n_pad = pl.cdiv(n_candidates, nsub * 128) * (nsub * 128)
    w = n_pad // nsub                            # lane width, multiple of 128

    v_pad, cnt = pl.pallas_call(
        functools.partial(randtest_kernel, n_rows=n_rows, n_valid=n_candidates,
                          targets=tuple(float(t) for t in targets),
                          eps=float(eps)),
        out_shape=(jax.ShapeDtypeStruct((3, nsub, w), jnp.float32),
                   jax.ShapeDtypeStruct((1, w), jnp.int32)),
        in_specs=[
            pl.BlockSpec(memory_space=pltpu.MemorySpace.SMEM),   # p_rows scalars
            pl.BlockSpec(memory_space=pltpu.MemorySpace.SMEM),   # mult scalars
        ],
        out_specs=(pl.BlockSpec(memory_space=pltpu.MemorySpace.VMEM),
                   pl.BlockSpec(memory_space=pltpu.MemorySpace.VMEM)),
    )(p_rows, mult)

    # Un-flatten / drop lane padding host-side (trivial XLA ops).
    v = v_pad.reshape(3, n_pad)[:, :n_candidates].T
    return v, cnt


if __name__ == "__main__":
    # ---- deterministic parameter setup (mirrors RandTest.__init__) ----
    a, b = -9, 9
    start_frame, end_frame = 1, 28
    value1, value2 = 1.0, 21.4979591
    tangent1, tangent2 = 1.0, -0.5
    frame_interval = end_frame - start_frame

    hermite = jnp.array(
        [value1, value2, tangent1 * frame_interval, tangent2 * frame_interval, 0.0],
        dtype=jnp.float32)                                    # (5,)

    t1 = (8 - start_frame) / frame_interval
    t2 = (12 - start_frame) / frame_interval
    t3 = (18 - start_frame) / frame_interval
    mult = jnp.array(
        [[t ** 4, t ** 3, t ** 2, t, 1.0] for t in (t1, t2, t3)],
        dtype=jnp.float32)                                    # (3, 5)

    # ---- deterministic `rows` (module brute-forces integer rows in [a, b)) ----
    key = jax.random.PRNGKey(0)
    n_rows = 4
    rows = jax.random.randint(key, (n_rows, 5), a, b).astype(jnp.float32)  # (4, 5)

    # ---- algebraic fold: only per-row hermite dot products go to the kernel ----
    p_rows = jnp.dot(rows, hermite)                           # (n_rows,)
    n_candidates = n_rows ** 5                                # 1024

    # ---- run the Pallas kernel ----
    v, cnt = randtest_forward(p_rows, mult, n_candidates)
    v = jax.block_until_ready(v)
    cnt = jax.block_until_ready(cnt)
    v_np = np.asarray(v)                                      # (N, 3) = [v1, v2, v3]
    n_matches_kernel = int(np.asarray(cnt).sum())

    # ---- glue: the module's acceptance test on the host side ----
    # NOTE: epsilon-compare stands in for round(x, 2) == target; they differ only
    # exactly at decimal rounding boundaries (the module's own check lives in
    # commented-out code, so this is glue, not the forward pass).
    targets = np.array([7.81, 11.32, 15.82], dtype=np.float32)
    matches_host = np.all(np.abs(v_np - targets) <= np.float32(0.005), axis=-1)
    assert int(matches_host.sum()) == n_matches_kernel

    # ---- correctness check against a reference mirroring forward()'s loops ----
    rows_np = np.asarray(rows)
    herm_np = np.asarray(hermite)
    mult_np = np.asarray(mult)
    cands = []
    for r5 in range(n_rows):                 # row5 outermost ...
        for r4 in range(n_rows):
            for r3 in range(n_rows):
                for r2 in range(n_rows):
                    for r1 in range(n_rows):  # ... row1 innermost
                        cands.append(np.stack([rows_np[r1], rows_np[r2],
                                               rows_np[r3], rows_np[r4], rows_np[r5]]))
    M = np.stack(cands).astype(np.float32)    # (N, 5, 5), rows [row1..row5]
    basis_ref = M @ herm_np                   # (N, 5)
    v_ref = basis_ref @ mult_np.T             # (N, 3)
    np.testing.assert_allclose(v_np, v_ref, rtol=1e-4, atol=1e-2)

    print("KERNEL_OK")
</pallas_src>

<mosaic_0001>
module attributes {stable_mosaic.version = 11 : i64} {
  func.func @randtest_kernel(%arg0: memref<4xf32, #tpu.memory_space<smem>>, %arg1: memref<3x5xf32, #tpu.memory_space<smem>>, %arg2: memref<3x8x128xf32, #tpu.memory_space<vmem>>, %arg3: memref<1x128xi32, #tpu.memory_space<vmem>>) attributes {dimension_semantics = [], scalar_prefetch = 0 : i64, scratch_operands = 0 : i64, tpu.core_type = #tpu.core_type<tc>} {
    %0 = tpu.iota {dimensions = array<i32: 0>} : vector<8x128xi32>
    %1 = tpu.iota {dimensions = array<i32: 1>} : vector<8x128xi32>
    %c128_i32 = arith.constant 128 : i32
    %2 = vector.broadcast %c128_i32 : i32 to vector<8x128xi32>
    %3 = arith.muli %0, %2 : vector<8x128xi32>
    %4 = arith.addi %3, %1 : vector<8x128xi32>
    %c0 = arith.constant 0 : index
    %5 = memref.load %arg0[%c0] : memref<4xf32, #tpu.memory_space<smem>>
    %c1 = arith.constant 1 : index
    %6 = memref.load %arg0[%c1] : memref<4xf32, #tpu.memory_space<smem>>
    %c2 = arith.constant 2 : index
    %7 = memref.load %arg0[%c2] : memref<4xf32, #tpu.memory_space<smem>>
    %c3 = arith.constant 3 : index
    %8 = memref.load %arg0[%c3] : memref<4xf32, #tpu.memory_space<smem>>
    %c0_0 = arith.constant 0 : index
    %c0_1 = arith.constant 0 : index
    %9 = memref.load %arg1[%c0_0, %c0_1] : memref<3x5xf32, #tpu.memory_space<smem>>
    %c0_2 = arith.constant 0 : index
    %c1_3 = arith.constant 1 : index
    %10 = memref.load %arg1[%c0_2, %c1_3] : memref<3x5xf32, #tpu.memory_space<smem>>
    %c0_4 = arith.constant 0 : index
    %c2_5 = arith.constant 2 : index
    %11 = memref.load %arg1[%c0_4, %c2_5] : memref<3x5xf32, #tpu.memory_space<smem>>
    %c0_6 = arith.constant 0 : index
    %c3_7 = arith.constant 3 : index
    %12 = memref.load %arg1[%c0_6, %c3_7] : memref<3x5xf32, #tpu.memory_space<smem>>
    %c0_8 = arith.constant 0 : index
    %c4 = arith.constant 4 : index
    %13 = memref.load %arg1[%c0_8, %c4] : memref<3x5xf32, #tpu.memory_space<smem>>
    %c1_9 = arith.constant 1 : index
    %c0_10 = arith.constant 0 : index
    %14 = memref.load %arg1[%c1_9, %c0_10] : memref<3x5xf32, #tpu.memory_space<smem>>
    %c1_11 = arith.constant 1 : index
    %c1_12 = arith.constant 1 : index
    %15 = memref.load %arg1[%c1_11, %c1_12] : memref<3x5xf32, #tpu.memory_space<smem>>
    %c1_13 = arith.constant 1 : index
    %c2_14 = arith.constant 2 : index
    %16 = memref.load %arg1[%c1_13, %c2_14] : memref<3x5xf32, #tpu.memory_space<smem>>
    %c1_15 = arith.constant 1 : index
    %c3_16 = arith.constant 3 : index
    %17 = memref.load %arg1[%c1_15, %c3_16] : memref<3x5xf32, #tpu.memory_space<smem>>
    %c1_17 = arith.constant 1 : index
    %c4_18 = arith.constant 4 : index
    %18 = memref.load %arg1[%c1_17, %c4_18] : memref<3x5xf32, #tpu.memory_space<smem>>
    %c2_19 = arith.constant 2 : index
    %c0_20 = arith.constant 0 : index
    %19 = memref.load %arg1[%c2_19, %c0_20] : memref<3x5xf32, #tpu.memory_space<smem>>
    %c2_21 = arith.constant 2 : index
    %c1_22 = arith.constant 1 : index
    %20 = memref.load %arg1[%c2_21, %c1_22] : memref<3x5xf32, #tpu.memory_space<smem>>
    %c2_23 = arith.constant 2 : index
    %c2_24 = arith.constant 2 : index
    %21 = memref.load %arg1[%c2_23, %c2_24] : memref<3x5xf32, #tpu.memory_space<smem>>
    %c2_25 = arith.constant 2 : index
    %c3_26 = arith.constant 3 : index
    %22 = memref.load %arg1[%c2_25, %c3_26] : memref<3x5xf32, #tpu.memory_space<smem>>
    %c2_27 = arith.constant 2 : index
    %c4_28 = arith.constant 4 : index
    %23 = memref.load %arg1[%c2_27, %c4_28] : memref<3x5xf32, #tpu.memory_space<smem>>
    %c0_i32 = arith.constant 0 : i32
    %24 = vector.broadcast %c0_i32 : i32 to vector<8x128xi32>
    %25 = arith.shrsi %4, %24 : vector<8x128xi32>
    %c3_i32 = arith.constant 3 : i32
    %26 = vector.broadcast %c3_i32 : i32 to vector<8x128xi32>
    %27 = arith.andi %25, %26 : vector<8x128xi32>
    %c0_i32_29 = arith.constant 0 : i32
    %28 = vector.broadcast %c0_i32_29 : i32 to vector<8x128xi32>
    %29 = arith.shrsi %27, %28 : vector<8x128xi32>
    %c1_i32 = arith.constant 1 : i32
    %30 = vector.broadcast %c1_i32 : i32 to vector<8x128xi32>
    %31 = arith.andi %29, %30 : vector<8x128xi32>
    %c1_i32_30 = arith.constant 1 : i32
    %32 = vector.broadcast %c1_i32_30 : i32 to vector<8x128xi32>
    %33 = arith.cmpi eq, %31, %32 : vector<8x128xi32>
    %34 = vector.broadcast %6 : f32 to vector<8x128xf32>
    %35 = vector.broadcast %5 : f32 to vector<8x128xf32>
    %36 = arith.select %33, %34, %35 : vector<8x128xi1>, vector<8x128xf32>
    %37 = vector.broadcast %8 : f32 to vector<8x128xf32>
    %38 = vector.broadcast %7 : f32 to vector<8x128xf32>
    %39 = arith.select %33, %37, %38 : vector<8x128xi1>, vector<8x128xf32>
    %c1_i32_31 = arith.constant 1 : i32
    %40 = vector.broadcast %c1_i32_31 : i32 to vector<8x128xi32>
    %41 = arith.shrsi %27, %40 : vector<8x128xi32>
    %c1_i32_32 = arith.constant 1 : i32
    %42 = vector.broadcast %c1_i32_32 : i32 to vector<8x128xi32>
    %43 = arith.andi %41, %42 : vector<8x128xi32>
    %c1_i32_33 = arith.constant 1 : i32
    %44 = vector.broadcast %c1_i32_33 : i32 to vector<8x128xi32>
    %45 = arith.cmpi eq, %43, %44 : vector<8x128xi32>
    %46 = arith.select %45, %39, %36 : vector<8x128xi1>, vector<8x128xf32>
    %47 = vector.broadcast %9 : f32 to vector<8x128xf32>
    %48 = arith.mulf %47, %46 : vector<8x128xf32>
    %49 = vector.broadcast %14 : f32 to vector<8x128xf32>
    %50 = arith.mulf %49, %46 : vector<8x128xf32>
    %51 = vector.broadcast %19 : f32 to vector<8x128xf32>
    %52 = arith.mulf %51, %46 : vector<8x128xf32>
    %c2_i32 = arith.constant 2 : i32
    %53 = vector.broadcast %c2_i32 : i32 to vector<8x128xi32>
    %54 = arith.shrsi %4, %53 : vector<8x128xi32>
    %c3_i32_34 = arith.constant 3 : i32
    %55 = vector.broadcast %c3_i32_34 : i32 to vector<8x128xi32>
    %56 = arith.andi %54, %55 : vector<8x128xi32>
    %c0_i32_35 = arith.constant 0 : i32
    %57 = vector.broadcast %c0_i32_35 : i32 to vector<8x128xi32>
    %58 = arith.shrsi %56, %57 : vector<8x128xi32>
    %c1_i32_36 = arith.constant 1 : i32
    %59 = vector.broadcast %c1_i32_36 : i32 to vector<8x128xi32>
    %60 = arith.andi %58, %59 : vector<8x128xi32>
    %c1_i32_37 = arith.constant 1 : i32
    %61 = vector.broadcast %c1_i32_37 : i32 to vector<8x128xi32>
    %62 = arith.cmpi eq, %60, %61 : vector<8x128xi32>
    %63 = vector.broadcast %6 : f32 to vector<8x128xf32>
    %64 = vector.broadcast %5 : f32 to vector<8x128xf32>
    %65 = arith.select %62, %63, %64 : vector<8x128xi1>, vector<8x128xf32>
    %66 = vector.broadcast %8 : f32 to vector<8x128xf32>
    %67 = vector.broadcast %7 : f32 to vector<8x128xf32>
    %68 = arith.select %62, %66, %67 : vector<8x128xi1>, vector<8x128xf32>
    %c1_i32_38 = arith.constant 1 : i32
    %69 = vector.broadcast %c1_i32_38 : i32 to vector<8x128xi32>
    %70 = arith.shrsi %56, %69 : vector<8x128xi32>
    %c1_i32_39 = arith.constant 1 : i32
    %71 = vector.broadcast %c1_i32_39 : i32 to vector<8x128xi32>
    %72 = arith.andi %70, %71 : vector<8x128xi32>
    %c1_i32_40 = arith.constant 1 : i32
    %73 = vector.broadcast %c1_i32_40 : i32 to vector<8x128xi32>
    %74 = arith.cmpi eq, %72, %73 : vector<8x128xi32>
    %75 = arith.select %74, %68, %65 : vector<8x128xi1>, vector<8x128xf32>
    %76 = vector.broadcast %10 : f32 to vector<8x128xf32>
    %77 = arith.mulf %76, %75 : vector<8x128xf32>
    %78 = arith.addf %48, %77 : vector<8x128xf32>
    %79 = vector.broadcast %15 : f32 to vector<8x128xf32>
    %80 = arith.mulf %79, %75 : vector<8x128xf32>
    %81 = arith.addf %50, %80 : vector<8x128xf32>
    %82 = vector.broadcast %20 : f32 to vector<8x128xf32>
    %83 = arith.mulf %82, %75 : vector<8x128xf32>
    %84 = arith.addf %52, %83 : vector<8x128xf32>
    %c4_i32 = arith.constant 4 : i32
    %85 = vector.broadcast %c4_i32 : i32 to vector<8x128xi32>
    %86 = arith.shrsi %4, %85 : vector<8x128xi32>
    %c3_i32_41 = arith.constant 3 : i32
    %87 = vector.broadcast %c3_i32_41 : i32 to vector<8x128xi32>
    %88 = arith.andi %86, %87 : vector<8x128xi32>
    %c0_i32_42 = arith.constant 0 : i32
    %89 = vector.broadcast %c0_i32_42 : i32 to vector<8x128xi32>
    %90 = arith.shrsi %88, %89 : vector<8x128xi32>
    %c1_i32_43 = arith.constant 1 : i32
    %91 = vector.broadcast %c1_i32_43 : i32 to vector<8x128xi32>
    %92 = arith.andi %90, %91 : vector<8x128xi32>
    %c1_i32_44 = arith.constant 1 : i32
    %93 = vector.broadcast %c1_i32_44 : i32 to vector<8x128xi32>
    %94 = arith.cmpi eq, %92, %93 : vector<8x128xi32>
    %95 = vector.broadcast %6 : f32 to vector<8x128xf32>
    %96 = vector.broadcast %5 : f32 to vector<8x128xf32>
    %97 = arith.select %94, %95, %96 : vector<8x128xi1>, vector<8x128xf32>
    %98 = vector.broadcast %8 : f32 to vector<8x128xf32>
    %99 = vector.broadcast %7 : f32 to vector<8x128xf32>
    %100 = arith.select %94, %98, %99 : vector<8x128xi1>, vector<8x128xf32>
    %c1_i32_45 = arith.constant 1 : i32
    %101 = vector.broadcast %c1_i32_45 : i32 to vector<8x128xi32>
    %102 = arith.shrsi %88, %101 : vector<8x128xi32>
    %c1_i32_46 = arith.constant 1 : i32
    %103 = vector.broadcast %c1_i32_46 : i32 to vector<8x128xi32>
    %104 = arith.andi %102, %103 : vector<8x128xi32>
    %c1_i32_47 = arith.constant 1 : i32
    %105 = vector.broadcast %c1_i32_47 : i32 to vector<8x128xi32>
    %106 = arith.cmpi eq, %104, %105 : vector<8x128xi32>
    %107 = arith.select %106, %100, %97 : vector<8x128xi1>, vector<8x128xf32>
    %108 = vector.broadcast %11 : f32 to vector<8x128xf32>
    %109 = arith.mulf %108, %107 : vector<8x128xf32>
    %110 = arith.addf %78, %109 : vector<8x128xf32>
    %111 = vector.broadcast %16 : f32 to vector<8x128xf32>
    %112 = arith.mulf %111, %107 : vector<8x128xf32>
    %113 = arith.addf %81, %112 : vector<8x128xf32>
    %114 = vector.broadcast %21 : f32 to vector<8x128xf32>
    %115 = arith.mulf %114, %107 : vector<8x128xf32>
    %116 = arith.addf %84, %115 : vector<8x128xf32>
    %c6_i32 = arith.constant 6 : i32
    %117 = vector.broadcast %c6_i32 : i32 to vector<8x128xi32>
    %118 = arith.shrsi %4, %117 : vector<8x128xi32>
    %c3_i32_48 = arith.constant 3 : i32
    %119 = vector.broadcast %c3_i32_48 : i32 to vector<8x128xi32>
    %120 = arith.andi %118, %119 : vector<8x128xi32>
    %c0_i32_49 = arith.constant 0 : i32
    %121 = vector.broadcast %c0_i32_49 : i32 to vector<8x128xi32>
    %122 = arith.shrsi %120, %121 : vector<8x128xi32>
    %c1_i32_50 = arith.constant 1 : i32
    %123 = vector.broadcast %c1_i32_50 : i32 to vector<8x128xi32>
    %124 = arith.andi %122, %123 : vector<8x128xi32>
    %c1_i32_51 = arith.constant 1 : i32
    %125 = vector.broadcast %c1_i32_51 : i32 to vector<8x128xi32>
    %126 = arith.cmpi eq, %124, %125 : vector<8x128xi32>
    %127 = vector.broadcast %6 : f32 to vector<8x128xf32>
    %128 = vector.broadcast %5 : f32 to vector<8x128xf32>
    %129 = arith.select %126, %127, %128 : vector<8x128xi1>, vector<8x128xf32>
    %130 = vector.broadcast %8 : f32 to vector<8x128xf32>
    %131 = vector.broadcast %7 : f32 to vector<8x128xf32>
    %132 = arith.select %126, %130, %131 : vector<8x128xi1>, vector<8x128xf32>
    %c1_i32_52 = arith.constant 1 : i32
    %133 = vector.broadcast %c1_i32_52 : i32 to vector<8x128xi32>
    %134 = arith.shrsi %120, %133 : vector<8x128xi32>
    %c1_i32_53 = arith.constant 1 : i32
    %135 = vector.broadcast %c1_i32_53 : i32 to vector<8x128xi32>
    %136 = arith.andi %134, %135 : vector<8x128xi32>
    %c1_i32_54 = arith.constant 1 : i32
    %137 = vector.broadcast %c1_i32_54 : i32 to vector<8x128xi32>
    %138 = arith.cmpi eq, %136, %137 : vector<8x128xi32>
    %139 = arith.select %138, %132, %129 : vector<8x128xi1>, vector<8x128xf32>
    %140 = vector.broadcast %12 : f32 to vector<8x128xf32>
    %141 = arith.mulf %140, %139 : vector<8x128xf32>
    %142 = arith.addf %110, %141 : vector<8x128xf32>
    %143 = vector.broadcast %17 : f32 to vector<8x128xf32>
    %144 = arith.mulf %143, %139 : vector<8x128xf32>
    %145 = arith.addf %113, %144 : vector<8x128xf32>
    %146 = vector.broadcast %22 : f32 to vector<8x128xf32>
    %147 = arith.mulf %146, %139 : vector<8x128xf32>
    %148 = arith.addf %116, %147 : vector<8x128xf32>
    %c8_i32 = arith.constant 8 : i32
    %149 = vector.broadcast %c8_i32 : i32 to vector<8x128xi32>
    %150 = arith.shrsi %4, %149 : vector<8x128xi32>
    %c3_i32_55 = arith.constant 3 : i32
    %151 = vector.broadcast %c3_i32_55 : i32 to vector<8x128xi32>
    %152 = arith.andi %150, %151 : vector<8x128xi32>
    %c0_i32_56 = arith.constant 0 : i32
    %153 = vector.broadcast %c0_i32_56 : i32 to vector<8x128xi32>
    %154 = arith.shrsi %152, %153 : vector<8x128xi32>
    %c1_i32_57 = arith.constant 1 : i32
    %155 = vector.broadcast %c1_i32_57 : i32 to vector<8x128xi32>
    %156 = arith.andi %154, %155 : vector<8x128xi32>
    %c1_i32_58 = arith.constant 1 : i32
    %157 = vector.broadcast %c1_i32_58 : i32 to vector<8x128xi32>
    %158 = arith.cmpi eq, %156, %157 : vector<8x128xi32>
    %159 = vector.broadcast %6 : f32 to vector<8x128xf32>
    %160 = vector.broadcast %5 : f32 to vector<8x128xf32>
    %161 = arith.select %158, %159, %160 : vector<8x128xi1>, vector<8x128xf32>
    %162 = vector.broadcast %8 : f32 to vector<8x128xf32>
    %163 = vector.broadcast %7 : f32 to vector<8x128xf32>
    %164 = arith.select %158, %162, %163 : vector<8x128xi1>, vector<8x128xf32>
    %c1_i32_59 = arith.constant 1 : i32
    %165 = vector.broadcast %c1_i32_59 : i32 to vector<8x128xi32>
    %166 = arith.shrsi %152, %165 : vector<8x128xi32>
    %c1_i32_60 = arith.constant 1 : i32
    %167 = vector.broadcast %c1_i32_60 : i32 to vector<8x128xi32>
    %168 = arith.andi %166, %167 : vector<8x128xi32>
    %c1_i32_61 = arith.constant 1 : i32
    %169 = vector.broadcast %c1_i32_61 : i32 to vector<8x128xi32>
    %170 = arith.cmpi eq, %168, %169 : vector<8x128xi32>
    %171 = arith.select %170, %164, %161 : vector<8x128xi1>, vector<8x128xf32>
    %172 = vector.broadcast %13 : f32 to vector<8x128xf32>
    %173 = arith.mulf %172, %171 : vector<8x128xf32>
    %174 = arith.addf %142, %173 : vector<8x128xf32>
    %175 = vector.broadcast %18 : f32 to vector<8x128xf32>
    %176 = arith.mulf %175, %171 : vector<8x128xf32>
    %177 = arith.addf %145, %176 : vector<8x128xf32>
    %178 = vector.broadcast %23 : f32 to vector<8x128xf32>
    %179 = arith.mulf %178, %171 : vector<8x128xf32>
    %180 = arith.addf %148, %179 : vector<8x128xf32>
    %c0_62 = arith.constant 0 : index
    %c0_63 = arith.constant 0 : index
    %c0_64 = arith.constant 0 : index
    %181 = vector.load %arg2[%c0_62, %c0_63, %c0_64] : memref<3x8x128xf32, #tpu.memory_space<vmem>>, vector<1x8x128xf32>
    %182 = vector.shape_cast %181 : vector<1x8x128xf32> to vector<8x128xf32>
    %183 = vector.shape_cast %174 : vector<8x128xf32> to vector<1x8x128xf32>
    tpu.vector_store %arg2[%c0_62, %c0_63, %c0_64], %183 {strides = array<i32>} : memref<3x8x128xf32, #tpu.memory_space<vmem>>, vector<1x8x128xf32>,
    %c1_65 = arith.constant 1 : index
    %c0_66 = arith.constant 0 : index
    %c0_67 = arith.constant 0 : index
    %184 = vector.load %arg2[%c1_65, %c0_66, %c0_67] : memref<3x8x128xf32, #tpu.memory_space<vmem>>, vector<1x8x128xf32>
    %185 = vector.shape_cast %184 : vector<1x8x128xf32> to vector<8x128xf32>
    %186 = vector.shape_cast %177 : vector<8x128xf32> to vector<1x8x128xf32>
    tpu.vector_store %arg2[%c1_65, %c0_66, %c0_67], %186 {strides = array<i32>} : memref<3x8x128xf32, #tpu.memory_space<vmem>>, vector<1x8x128xf32>,
    %c2_68 = arith.constant 2 : index
    %c0_69 = arith.constant 0 : index
    %c0_70 = arith.constant 0 : index
    %187 = vector.load %arg2[%c2_68, %c0_69, %c0_70] : memref<3x8x128xf32, #tpu.memory_space<vmem>>, vector<1x8x128xf32>
    %188 = vector.shape_cast %187 : vector<1x8x128xf32> to vector<8x128xf32>
    %189 = vector.shape_cast %180 : vector<8x128xf32> to vector<1x8x128xf32>
    tpu.vector_store %arg2[%c2_68, %c0_69, %c0_70], %189 {strides = array<i32>} : memref<3x8x128xf32, #tpu.memory_space<vmem>>, vector<1x8x128xf32>,
    %c1024_i32 = arith.constant 1024 : i32
    %190 = vector.broadcast %c1024_i32 : i32 to vector<8x128xi32>
    %191 = arith.cmpi slt, %4, %190 : vector<8x128xi32>
    %cst = arith.constant 7.810000e+00 : f32
    %192 = vector.broadcast %cst : f32 to vector<8x128xf32>
    %193 = arith.subf %174, %192 : vector<8x128xf32>
    %194 = math.absf %193 : vector<8x128xf32>
    %cst_71 = arith.constant 5.000000e-03 : f32
    %195 = vector.broadcast %cst_71 : f32 to vector<8x128xf32>
    %196 = arith.cmpf ole, %194, %195 : vector<8x128xf32>
    %197 = arith.andi %191, %196 : vector<8x128xi1>
    %cst_72 = arith.constant 1.132000e+01 : f32
    %198 = vector.broadcast %cst_72 : f32 to vector<8x128xf32>
    %199 = arith.subf %177, %198 : vector<8x128xf32>
    %200 = math.absf %199 : vector<8x128xf32>
    %cst_73 = arith.constant 5.000000e-03 : f32
    %201 = vector.broadcast %cst_73 : f32 to vector<8x128xf32>
    %202 = arith.cmpf ole, %200, %201 : vector<8x128xf32>
    %203 = arith.andi %197, %202 : vector<8x128xi1>
    %cst_74 = arith.constant 1.582000e+01 : f32
    %204 = vector.broadcast %cst_74 : f32 to vector<8x128xf32>
    %205 = arith.subf %180, %204 : vector<8x128xf32>
    %206 = math.absf %205 : vector<8x128xf32>
    %cst_75 = arith.constant 5.000000e-03 : f32
    %207 = vector.broadcast %cst_75 : f32 to vector<8x128xf32>
    %208 = arith.cmpf ole, %206, %207 : vector<8x128xf32>
    %209 = arith.andi %203, %208 : vector<8x128xi1>
    %cst_76 = arith.constant 1.000000e+00 : f32
    %cst_77 = arith.constant 0.000000e+00 : f32
    %210 = vector.broadcast %cst_76 : f32 to vector<8x128xf32>
    %211 = vector.broadcast %cst_77 : f32 to vector<8x128xf32>
    %212 = arith.select %209, %210, %211 : vector<8x128xi1>, vector<8x128xf32>
    %cst_78 = arith.constant dense<0.000000e+00> : vector<128xf32>
    %213 = vector.multi_reduction <add>, %212, %cst_78 [0] : vector<8x128xf32> to vector<128xf32>
    %214 = vector.shape_cast %213 : vector<128xf32> to vector<1x128xf32>
    %215 = arith.fptosi %214 : vector<1x128xf32> to vector<1x128xi32>
    %c0_79 = arith.constant 0 : index
    %c0_80 = arith.constant 0 : index
    %216 = vector.load %arg3[%c0_79, %c0_80] : memref<1x128xi32, #tpu.memory_space<vmem>>, vector<1x128xi32>
    tpu.vector_store %arg3[%c0_79, %c0_80], %215 {strides = array<i32>} : memref<1x128xi32, #tpu.memory_space<vmem>>, vector<1x128xi32>,
    return
  }
}

</mosaic_0001>

<bundles_post_ra>
// kernel: tpu_custom_call.1
= control target key start
LH: loop header
LB: loop body
LE: loop exit
PB: predicated region body
PF: predicated region fallthrough
CT: control target
= control target key end

     0   :  { %9 = vsyncpa [#allocation4], 0  ;;  %s502_s0 = inlined_call_operand.hbm [shape: f32[4], index: 0, kind: input, shape index: {}]   ;;  %s503_s1 = inlined_call_operand.hbm [shape: f32[3,5], index: 1, kind: input, shape index: {}]   ;;  %s504_s2 = inlined_call_operand.hbm [shape: f32[3,8,128], index: 2, kind: output, shape index: {0}]   ;;  %s505_s3 = inlined_call_operand.hbm [shape: s32[1,128], index: 3, kind: output, shape index: {1}]  }
   0x1   :  { %10 = vsyncpa [#allocation6], 0 }
   0x2   :  { %11 = vsyncpa [#allocation3], 0 }
   0x3   :  { %12 = vsyncpa [#allocation9], 0  ;;  %s244_s14 = scalar_lea.hbm %s502_s0, 16 }
   0x4   :  { %p245_p0 = scmp.ne.s32.totalorder %s502_s0, %s244_s14  ;;  %p248_p1 = scmp.lt.u32.totalorder %s244_s14, %s502_s0 }
   0x6   :  { %p250_p2 = pnand %p248_p1, %p245_p0 }
   0x8   :  { %253 = shalt.err (!%p250_p2)
}
   0x9   :  { %s316_s19 = smov [#allocation2]   ;;  %s254_s24 = scalar_lea.hbm %s503_s1, 64 }
   0xa   :  { %20 = dma.hbm_to_smem %s502_s0, 16, %s316_s19, [#allocation4]  }
   0xb   :  { %p255_p3 = scmp.ne.s32.totalorder %s503_s1, %s254_s24  ;;  %p258_p4 = scmp.lt.u32.totalorder %s254_s24, %s503_s1 }
   0xd   :  { %p260_p5 = pnand %p258_p4, %p255_p3 }
   0xf   :  { %263 = shalt.err (!%p260_p5)
}
  0x10   :  { %s317_s29 = smov [#allocation5]  }
  0x11   :  { %28 = dma.hbm_to_smem %s503_s1, 64, %s317_s29, [#allocation6]  }
  0x12   :  { %308 = dma.done.wait [#allocation4], 16  }
  0x13   :  { %309 = vsyncadd [#allocation4], 4294967280 }
  0x14   :  { %310 = dma.done.wait [#allocation6], 64  }
  0x15   :  { %311 = vsyncadd [#allocation6], 4294967232 }
  0x16   :  { %35 = sfence }
  0x17   :  { %v36_v0 = vlaneseq  ;;  %s42_s0 = sld [smem:[#allocation2]]  ;;  %s215_s5 = sld [smem:[#allocation2 + $0x1]] }
  0x18   :  { %s216_s6 = sld [smem:[#allocation2 + $0x2]]  ;;  %s217_s7 = sld [smem:[#allocation2 + $0x3]] }
  0x19   :  { %v37_v1 = vshrl.u32 %v36_v0, 7  ;;  %v39_v2 = vand.u32 127, %v36_v0  ;;  %s367_s8 = sld [smem:[#allocation5]]  ;;  %s369_s9 = sld [smem:[#allocation5 + $0x1]] }
  0x1a   :  { %s371_s10 = sld [smem:[#allocation5 + $0x2]]  ;;  %s373_s1 = sld [smem:[#allocation5 + $0x3]] }
  0x1b   :  { %v40_v3 = vmul.u32 128, %v37_v1  ;;  %s375_s11 = sld [smem:[#allocation5 + $0x4]]  ;;  %s395_s12 = sld [smem:[#allocation5 + $0x80]] }
  0x1c   :  { %s399_s13 = sld [smem:[#allocation5 + $0x81]]  ;;  %s405_s14 = sld [smem:[#allocation5 + $0x82]] }
  0x1d   :  { %v377_v4 = vadd.s32 %v40_v3, %v39_v2  ;;  %v379_v5 = vstv %s215_s5  ;;  %v381_v6 = vstv %s42_s0  ;;  %s423_s15 = sld [smem:[#allocation5 + $0x83]]  ;;  %s429_s16 = sld [smem:[#allocation5 + $0x84]] }
  0x1e   :  { %v383_v7 = vstv %s217_s7  ;;  %v386_v9 = vstv %s216_s6  ;;  %s439_s17 = sld [smem:[#allocation5 + $0x100]]  ;;  %s441_s18 = sld [smem:[#allocation5 + $0x101]] }
  0x1f   :  { %v61_v8 = vand.u32 3, %v377_v4  ;;  %v74_v10 = vstv %s367_s8  ;;  %v80_v11 = vshra.s32 %v377_v4, 2  ;;  %v90_v12 = vstv %s369_s9  ;;  %s445_s19 = sld [smem:[#allocation5 + $0x102]]  ;;  %s447_s20 = sld [smem:[#allocation5 + $0x103]] }
  0x20   :  { %v99_v13 = vshra.s32 %v377_v4, 4  ;;  %v109_v14 = vstv %s371_s10  ;;  %v118_v15 = vshra.s32 %v377_v4, 6  ;;  %v128_v19 = vstv %s373_s1  ;;  %s449_s21 = sld [smem:[#allocation5 + $0x104]]  ;;  %s318_s22 = smov [#allocation7]  }
  0x21   :  { %v62_v16 = vand.u32 1, %v61_v8  ;;  %v70_v17 = vshra.s32 %v61_v8, 1  ;;  %v81_v18 = vand.u32 3, %v80_v11  ;;  %v137_v22 = vshra.s32 %v377_v4, 8  ;;  %s188_s23 = sshll.u32 %s318_s22, 4  ;;  %s189_s23 = int_to_ptr.vmem [resolvable:$true] %s188_s23 }
  0x22   :  { %v100_v20 = vand.u32 3, %v99_v13  ;;  %v119_v21 = vand.u32 3, %v118_v15  ;;  %v147_v23 = vstv %s375_s11  ;;  %v76_v49 = vstv %s395_s12  ;;  %s264_s24 = scalar_lea.vmem %s189_s23, 384  ;;  %p269_p7 = scmp.lt.s32.totalorder %s189_s23, %s189_s23 }
  0x23   :  { %vm63_vm0 = vcmp.eq.s32.totalorder %v62_v16, 1  ;;  %v71_v24 = vand.u32 1, %v70_v17  ;;  %v82_v25 = vand.u32 1, %v81_v18  ;;  %v86_v26 = vshra.s32 %v81_v18, 1  ;;  %p265_p6 = scmp.ne.s32.totalorder %s189_s23, %s264_s24  ;;  %p270_p8 = scmp.lt.s32.totalorder %s264_s24, %s264_s24 }
  0x24   :  { %v66_v27 = vsel %vm63_vm0, %v379_v5, %v381_v6  ;;  %v69_v28 = vsel %vm63_vm0, %v383_v7, %v386_v9  ;;  %v101_v29 = vand.u32 1, %v100_v20  ;;  %v105_v30 = vshra.s32 %v100_v20, 1 }
  0x25   :  { %vm72_vm1 = vcmp.eq.s32.totalorder %v71_v24, 1  ;;  %vm83_vm2 = vcmp.eq.s32.totalorder %v82_v25, 1  ;;  %v87_v31 = vand.u32 1, %v86_v26  ;;  %v120_v32 = vand.u32 1, %v119_v21  ;;  %p271_p9 = por %p270_p8, %p269_p7 }
  0x26   :  { %v73_v33 = vsel %vm72_vm1, %v69_v28, %v66_v27  ;;  %v84_v34 = vsel %vm83_vm2, %v379_v5, %v381_v6  ;;  %v85_v35 = vsel %vm83_vm2, %v383_v7, %v386_v9  ;;  %vm411_vm3 = vcmp.eq.s32.totalorder %v101_v29, 1 }
  0x27   :  { %v75_v37 = vmul.f32 %v74_v10, %v73_v33  ;;  %vm88_vm4 = vcmp.eq.s32.totalorder %v87_v31, 1  ;;  %v103_v38 = vsel %vm411_vm3, %v379_v5, %v381_v6  ;;  %v104_v39 = vsel %vm411_vm3, %v383_v7, %v386_v9  ;;  %p272_p10 = pnand %p271_p9, %p265_p6 }
  0x28   :  { %v89_v40 = vsel %vm88_vm4, %v85_v35, %v84_v34  ;;  %v106_v41 = vand.u32 1, %v105_v30  ;;  %vm425_vm5 = vcmp.eq.s32.totalorder %v120_v32, 1  ;;  %v124_v43 = vshra.s32 %v119_v21, 1 }
  0x29   :  { %v91_v44 = vmul.f32 %v90_v12, %v89_v40  ;;  %v122_v45 = vsel %vm425_vm5, %v379_v5, %v381_v6  ;;  %v123_v46 = vsel %vm425_vm5, %v383_v7, %v386_v9  ;;  %v138_v47 = vand.u32 3, %v137_v22 }
  0x2a   :  { %vm107_vm6 = vcmp.eq.s32.totalorder %v106_v41, 1  ;;  %v125_v48 = vand.u32 1, %v124_v43  ;;  %v93_v50 = vstv %s399_s13  ;;  %v77_v56 = vmul.f32 %v76_v49, %v73_v33 }
  0x2b   :  { %v92_v51 = vadd.f32 %v91_v44, %v75_v37  ;;  %v108_v52 = vsel %vm107_vm6, %v104_v39, %v103_v38  ;;  %v139_v53 = vand.u32 1, %v138_v47  ;;  %v143_v54 = vshra.s32 %v138_v47, 1 }
  0x2c   :  { %v110_v55 = vmul.f32 %v109_v14, %v108_v52  ;;  %vm126_vm7 = vcmp.eq.s32.totalorder %v125_v48, 1  ;;  %v94_v57 = vmul.f32 %v93_v50, %v89_v40  ;;  %v112_v60 = vstv %s405_s14 }
  0x2d   :  { %v127_v58 = vsel %vm126_vm7, %v123_v46, %v122_v45  ;;  %vm140_vm8 = vcmp.eq.s32.totalorder %v139_v53, 1  ;;  %v144_v59 = vand.u32 1, %v143_v54  ;;  %v113_v2 = vmul.f32 %v112_v60, %v108_v52 }
  0x2e   :  { %v111_v61 = vadd.f32 %v110_v55, %v92_v51  ;;  %v129_v62 = vmul.f32 %v128_v19, %v127_v58  ;;  %v141_v63 = vsel %vm140_vm8, %v379_v5, %v381_v6  ;;  %v142_v0 = vsel %vm140_vm8, %v383_v7, %v386_v9 }
  0x2f   :  { %vm145_vm9 = vcmp.eq.s32.totalorder %v144_v59, 1  ;;  %v95_v1 = vadd.f32 %v94_v57, %v77_v56  ;;  %v131_v3 = vstv %s423_s15  ;;  %v150_v12 = vstv %s429_s16 }
  0x30   :  { %v130_v8 = vadd.f32 %v129_v62, %v111_v61  ;;  %v146_v10 = vsel %vm145_vm9, %v142_v0, %v141_v63  ;;  %v132_v11 = vmul.f32 %v131_v3, %v127_v58  ;;  %v78_v16 = vstv %s439_s17 }
  0x31   :  { %v148_v13 = vmul.f32 %v147_v23, %v146_v10  ;;  %v114_v14 = vadd.f32 %v113_v2, %v95_v1  ;;  %v151_v15 = vmul.f32 %v150_v12, %v146_v10  ;;  %v79_v5 = vmul.f32 %v78_v16, %v73_v33 }
  0x32   :  { %v96_v6 = vstv %s441_s18  ;;  %v115_v17 = vstv %s445_s19  ;;  %v134_v18 = vstv %s447_s20  ;;  %v153_v21 = vstv %s449_s21 }
  0x33   :  { %v149_v7 = vadd.f32 %v148_v13, %v130_v8  ;;  %v133_v9 = vadd.f32 %v132_v11, %v114_v14  ;;  %v97_v19 = vmul.f32 %v96_v6, %v89_v40  ;;  %v116_v20 = vmul.f32 %v115_v17, %v108_v52 }
  0x34   :  { %v135_v26 = vmul.f32 %v134_v18, %v127_v58  ;;  %v154_v29 = vmul.f32 %v153_v21, %v146_v10  ;;  %vm161_vm10 = vcmp.lt.s32.totalorder %v377_v4, 1024 }
  0x35   :  { %156 = vst [vmem:[#allocation7] sm:$0xff] %v149_v7  ;;  %v232_v22 = vadd.f32 -7.81, %v149_v7  ;;  %v152_v24 = vadd.f32 %v151_v15, %v133_v9  ;;  %v98_v25 = vadd.f32 %v97_v19, %v79_v5 }
  0x37   :  { %v163_v27 = vand.u32 2147483647, %v232_v22  ;;  %158 = vst [vmem:[#allocation7 + $0x8] sm:$0xff] %v152_v24  ;;  %v233_v23 = vadd.f32 -11.32, %v152_v24  ;;  %v117_v28 = vadd.f32 %v116_v20, %v98_v25 }
  0x39   :  { %vm164_vm11 = vcmp.le.f32.partialorder %v163_v27, 0.005  ;;  %v167_v30 = vand.u32 2147483647, %v233_v23  ;;  %v136_v31 = vadd.f32 %v135_v26, %v117_v28 }
  0x3a   :  { %vm466_vm12 = vmand %vm161_vm10, %vm164_vm11 }
  0x3b   :  { %v155_v32 = vadd.f32 %v154_v29, %v136_v31  ;;  %vm470_vm13 = vcmp.le.f32.partialorder %v167_v30, 0.005 }
  0x3d   :  { %160 = vst [vmem:[#allocation7 + $0x10] sm:$0xff] %v155_v32  ;;  %v234_v35 = vadd.f32 -15.82, %v155_v32 }
  0x3e   :  { %275 = shalt.err (!%p272_p10)
}
  0x3f   :  { %s276_s27 = scalar_lea.hbm %s504_s2, 384 }
  0x40   :  { %p277_p11 = scmp.ne.s32.totalorder %s504_s2, %s276_s27  ;;  %p280_p12 = scmp.lt.u32.totalorder %s276_s27, %s504_s2 }
  0x42   :  { %p282_p13 = pnand %p280_p12, %p277_p11 }
  0x44   :  { %285 = shalt.err (!%p282_p13)
}
  0x45   :  { %s319_s0 = smov 128   ;;  %s320_s5 = smov 8   ;;  %vm169_vm14 = vmand %vm466_vm12, %vm470_vm13  ;;  %v171_v4 = vand.u32 2147483647, %v234_v35  ;;  %v321_v36 = vmov 0.0  }
  0x46   :  { %194 = dma.vmem_to_hbm [thread:$0]  %s189_s23, 384, %s504_s2, [#allocation3], %s319_s0, %s319_s0, %s320_s5  }
  0x47   :  { %vm172_vm15 = vcmp.le.f32.partialorder %v171_v4, 0.005  ;;  %s322_s8 = smov [#allocation8]  }
  0x48   :  { %vm173_vm0 = vmand %vm169_vm14, %vm172_vm15  ;;  %s201_s9 = sshll.u32 %s322_s8, 4  ;;  %s202_s9 = int_to_ptr.vmem [resolvable:$true] %s201_s9 }
  0x49   :  { %v174_v37 = vsel %vm173_vm0, 1.0, %v321_v36  ;;  %s286_s2 = scalar_lea.vmem %s202_s9, 16  ;;  %s290_s10 = scalar_lea.vmem %s202_s9, 32 }
  0x4a   :  { %v175_v38 = vrot.slane %v174_v37, 4  ;;  %p287_p0 = scmp.ne.s32.totalorder %s202_s9, %s286_s2  ;;  %p291_p1 = scmp.lt.s32.totalorder %s202_s9, %s202_s9 }
  0x4b   :  { %p292_p2 = scmp.lt.s32.totalorder %s290_s10, %s286_s2 }
  0x4c   :  { %v176_v39 = vadd.f32 %v175_v38, %v174_v37 }
  0x4d   :  { %p293_p3 = por %p292_p2, %p291_p1 }
  0x4e   :  { %v177_v40 = vrot.slane %v176_v39, 2 }
  0x4f   :  { %p294_p4 = pnand %p293_p3, %p287_p0 }
  0x50   :  { %v178_v41 = vadd.f32 %v177_v40, %v176_v39 }
  0x52   :  { %v179_v42 = vrot.slane %v178_v41, 1 }
  0x54   :  { %v180_v43 = vadd.f32 %v179_v42, %v178_v41 }
  0x56   :  { %v235_v44 = vtrunc.f32 %v180_v43 }
  0x58   :  { %v236_v45 = vcvt.f32.s32 %v235_v44 }
  0x5a   :  { %182 = vst [vmem:[#allocation8] sm:$0x1] %v236_v45 }
  0x5b   :  { %297 = shalt.err (!%p294_p4)
}
  0x5c   :  { %s298_s12 = scalar_lea.hbm %s505_s3, 16 }
  0x5d   :  { %p299_p5 = scmp.ne.s32.totalorder %s505_s3, %s298_s12  ;;  %p302_p6 = scmp.lt.u32.totalorder %s298_s12, %s505_s3 }
  0x5f   :  { %p304_p7 = pnand %p302_p6, %p299_p5 }
  0x61   :  { %307 = shalt.err (!%p304_p7)
}
  0x62   :  { %204 = dma.vmem_to_hbm [thread:$0]  %s202_s9, 16, %s505_s3, [#allocation9]  }
  0x63   :  { %312 = dma.done.wait [#allocation3], 384  }
  0x64   :  { %313 = vsyncadd [#allocation3], 4294966912 }
  0x65   :  { %314 = dma.done.wait [#allocation9], 16  }
  0x66   :  { %315 = vsyncadd [#allocation9], 4294967280 }
  0x67   :  { %211 = vsyncpa [#allocation3], 1 }
  0x68   :  { %212 = vsyncpa [#allocation9], 1 }
  0x69   :  { %213 = vsyncpa [#allocation4], 1 }
  0x6a   :  { %214 = vsyncpa [#allocation6], 1 }

</bundles_post_ra>
